<compile_context>
chip_gen: v6e
topology: v6e:2x2x1
jax: 0.10.0
libtpu: 0.0.40
codegen_flags: <defaults>
</compile_context>

<pallas_src>
import functools
import math

import jax
import jax.numpy as jnp
from jax import lax
from jax.experimental import pallas as pl
from jax.experimental.pallas import tpu as pltpu


def _pick_tile(n, candidates):
    for c in candidates:
        if n % c == 0:
            return c
    return n


def _scoped_vmem(need_bytes):
    # Explicit scoped-VMEM limit with headroom, clamped to values every TPU
    # generation accepts (re-derive the cap per generation for huge shapes).
    return int(min(max(2 * need_bytes, 32 << 20), 64 << 20))


# --------------------------------------------------------------------------
# Kernel 1: fused Q/K/V projection (+ mask & scale folded into Q).
# --------------------------------------------------------------------------
def qkv_proj_kernel(q_ref, k_ref, v_ref, m_ref, wq_ref, wk_ref, wv_ref,
                    qp_ref, kp_ref, vp_ref, *, scale):
    # q/k/v_ref: [tr, D]; m_ref: [tr, 1] f32; w*_ref: [D, D] (pre-transposed)
    qp = jnp.dot(q_ref[...], wq_ref[...], preferred_element_type=jnp.float32)
    # Fold the multiplicative per-query mask and 1/sqrt(d_head) into Q once.
    qp_ref[...] = (qp * (m_ref[...] * scale)).astype(qp_ref.dtype)
    kp_ref[...] = jnp.dot(k_ref[...], wk_ref[...],
                          preferred_element_type=jnp.float32).astype(kp_ref.dtype)
    vp_ref[...] = jnp.dot(v_ref[...], wv_ref[...],
                          preferred_element_type=jnp.float32).astype(vp_ref.dtype)


# --------------------------------------------------------------------------
# Kernel 2: flash-style attention (online softmax over KV tiles) + fused Wo.
# --------------------------------------------------------------------------
def attn_kernel(q_ref, k_ref, v_ref, wo_ref, bo_ref, o_ref,
                m_sc, l_sc, acc_sc, *, h, d_head, compute_dtype):
    # q_ref: [tq, D] (mask & scale already folded); k/v_ref: [tk, D]
    # wo_ref: [D, D] (pre-transposed); bo_ref: [1, D] f32; o_ref: [tq, D] f32
    # m_sc/l_sc: [h, tq, 1] f32; acc_sc: [tq, D] f32
    j = pl.program_id(2)

    @pl.when(j == 0)
    def _():
        m_sc[...] = jnp.full_like(m_sc, -jnp.inf)
        l_sc[...] = jnp.zeros_like(l_sc)
        acc_sc[...] = jnp.zeros_like(acc_sc)

    q = q_ref[...]
    k = k_ref[...]
    v = v_ref[...]

    # TODO(synk): for large h, switch to lax.fori_loop(..., unroll=True) with
    # pl.ds head slices so only one head's working set stays live.
    for i in range(h):
        lo = i * d_head
        qh = q[:, lo:lo + d_head]
        kh = k[:, lo:lo + d_head]
        vh = v[:, lo:lo + d_head]
        s = lax.dot_general(qh, kh, (((1,), (1,)), ((), ())),
                            preferred_element_type=jnp.float32)      # [tq, tk]
        m_prev = m_sc[i]                                             # [tq, 1]
        m_new = jnp.maximum(m_prev, jnp.max(s, axis=-1, keepdims=True))
        alpha = jnp.exp(m_prev - m_new)
        p = jnp.exp(s - m_new)
        l_sc[i] = alpha * l_sc[i] + jnp.sum(p, axis=-1, keepdims=True)
        acc_sc[:, lo:lo + d_head] = (
            alpha * acc_sc[:, lo:lo + d_head]
            + jnp.dot(p.astype(compute_dtype), vh,
                      preferred_element_type=jnp.float32))
        m_sc[i] = m_new

    @pl.when(j == pl.num_programs(2) - 1)
    def _():
        tq = q.shape[0]
        d_model = wo_ref.shape[1]
        if d_head % 128 == 0:
            # Lane-aligned heads: concat is free, one full-width Wo matmul.
            parts = [acc_sc[:, i * d_head:(i + 1) * d_head]
                     * pl.reciprocal(l_sc[i], approx=True) for i in range(h)]
            y = jnp.concatenate(parts, axis=-1).astype(compute_dtype)
            out = jnp.dot(y, wo_ref[...], preferred_element_type=jnp.float32)
        else:
            # Narrow heads: fold Wo per head to avoid lane repacking.
            out = jnp.zeros((tq, d_model), jnp.float32)
            for i in range(h):
                lo = i * d_head
                y_h = (acc_sc[:, lo:lo + d_head]
                       * pl.reciprocal(l_sc[i], approx=True)).astype(compute_dtype)
                out = out + jnp.dot(y_h, wo_ref[lo:lo + d_head, :],
                                    preferred_element_type=jnp.float32)
        o_ref[...] = (out + bo_ref[...]).astype(o_ref.dtype)


# --------------------------------------------------------------------------
# Wrapper
# --------------------------------------------------------------------------
def masked_multi_head_attention(v, k, q, m, wq, wk, wv, wo, bo, *, h,
                                compute_dtype=jnp.bfloat16):
    """Matches MaskedMultiHeadAttention.forward(v, k, q, m).

    compute_dtype sets MXU operand precision (bf16 recommended on v5e/v6e/v7x;
    all accumulation, softmax math and the bias add stay f32).  Pass
    jnp.float32 for bit-closer parity with the PyTorch module.
    """
    B, S, D = q.shape
    d_head = D // h
    assert h * d_head == D, "d_model must be divisible by h"
    scale = 1.0 / math.sqrt(d_head)
    ib = jnp.dtype(compute_dtype).itemsize

    # Fuse per-head weights into [D, D] matrices, pre-transposed (x @ W), and
    # cast to compute_dtype in the wrapper (no per-grid-step casts, half the
    # weight DMA bytes when bf16).
    wq_t = jnp.transpose(wq.reshape(h * d_head, D)).astype(compute_dtype)
    wk_t = jnp.transpose(wk.reshape(h * d_head, D)).astype(compute_dtype)
    wv_t = jnp.transpose(wv.reshape(h * d_head, D)).astype(compute_dtype)
    wo_t = jnp.transpose(wo).astype(compute_dtype)
    bo2 = bo.astype(jnp.float32)[None, :]                # bias added in f32

    # ---- 1) Q/K/V projections: once per token, NOT once per q-tile. ----
    R = B * S
    q2 = q.reshape(R, D).astype(compute_dtype)
    k2 = k.reshape(R, D).astype(compute_dtype)
    v2 = v.reshape(R, D).astype(compute_dtype)
    m2 = m.astype(jnp.float32).reshape(R, 1)

    tr = _pick_tile(R, (512, 256, 128))
    proj_need = 2 * (4 * tr * D * ib + tr * 4 + 3 * D * D * ib) + 3 * tr * D * ib
    row_spec = pl.BlockSpec((tr, D), lambda r: (r, 0))
    msk_spec = pl.BlockSpec((tr, 1), lambda r: (r, 0))
    w_spec = pl.BlockSpec((D, D), lambda r: (0, 0))      # resident weights
    out_sds = jax.ShapeDtypeStruct((R, D), compute_dtype)

    qp, kp, vp = pl.pallas_call(
        functools.partial(qkv_proj_kernel, scale=scale),
        out_shape=(out_sds, out_sds, out_sds),
        grid=(R // tr,),
        in_specs=[row_spec, row_spec, row_spec, msk_spec, w_spec, w_spec, w_spec],
        out_specs=(row_spec, row_spec, row_spec),
        compiler_params=pltpu.CompilerParams(
            dimension_semantics=("parallel",),
            vmem_limit_bytes=_scoped_vmem(proj_need)),
    )(q2, k2, v2, m2, wq_t, wk_t, wv_t)

    qp = qp.reshape(B, S, D)
    kp = kp.reshape(B, S, D)
    vp = vp.reshape(B, S, D)

    # ---- 2) Flash attention over (batch, q-tile, kv-tile) + fused Wo. ----
    # Bigger q tiles amortize per-step overhead on v5e/v6e; the O(tq*tk)
    # score footprint keeps the same choice viable on v7x's 64 MiB VMEM.
    tq = _pick_tile(S, (256, 128))
    tk = _pick_tile(S, (512, 256, 128))
    grid = (B, S // tq, S // tk)

    q_spec = pl.BlockSpec((None, tq, D), lambda b, i, j: (b, i, 0))
    kv_spec = pl.BlockSpec((None, tk, D), lambda b, i, j: (b, j, 0))
    wo_spec = pl.BlockSpec((D, D), lambda b, i, j: (0, 0))     # resident
    bo_spec = pl.BlockSpec((1, D), lambda b, i, j: (0, 0))     # resident
    out_spec = pl.BlockSpec((None, tq, D), lambda b, i, j: (b, i, 0))

    attn_need = (2 * ((tq + 2 * tk) * D * ib + D * D * ib + D * 4 + tq * D * 4)
                 + (2 * h * tq + tq * D) * 4 + 2 * tq * tk * 4)

    kernel = functools.partial(attn_kernel, h=h, d_head=d_head,
                               compute_dtype=compute_dtype)

    return pl.pallas_call(
        kernel,
        out_shape=jax.ShapeDtypeStruct((B, S, D), jnp.float32),
        grid=grid,
        in_specs=[q_spec, kv_spec, kv_spec, wo_spec, bo_spec],
        out_specs=out_spec,
        scratch_shapes=[pltpu.VMEM((h, tq, 1), jnp.float32),   # running max
                        pltpu.VMEM((h, tq, 1), jnp.float32),   # running sum
                        pltpu.VMEM((tq, D), jnp.float32)],     # accumulator
        compiler_params=pltpu.CompilerParams(
            dimension_semantics=("parallel", "parallel", "arbitrary"),
            vmem_limit_bytes=_scoped_vmem(attn_need)),
    )(qp, kp, vp, wo_t, bo2)


def reference(v, k, q, m, wq, wk, wv, wo, bo, *, h):
    """Pure-JAX re-implementation of the PyTorch forward for validation."""
    B, S, D = q.shape
    d_head = D // h
    outs = []
    for i in range(h):
        qp = q @ wq[i].T
        kp = k @ wk[i].T
        vp = v @ wv[i].T
        a = (qp @ jnp.swapaxes(kp, -1, -2)) / (d_head ** 0.5)
        a = a * m[:, :, None]
        a = jax.nn.softmax(a, axis=-1)
        outs.append(a @ vp)
    y = jnp.concatenate(outs, axis=-1)
    return y @ wo.T + bo


if __name__ == "__main__":
    B, S, d_model, h = 2, 8, 32, 4
    d_head = d_model // h

    key = jax.random.PRNGKey(0)
    kq, kk, kv, km, kwq, kwk, kwv, kwo, kbo = jax.random.split(key, 9)

    q = jax.random.normal(kq, (B, S, d_model), jnp.float32)
    k = jax.random.normal(kk, (B, S, d_model), jnp.float32)
    v = jax.random.normal(kv, (B, S, d_model), jnp.float32)
    # mask of 0/1 per (batch, query-position)
    m = (jax.random.uniform(km, (B, S)) > 0.3).astype(jnp.float32)

    # Xavier-normal-style init (shapes match nn.Linear [out, in]).
    std_head = math.sqrt(2.0 / (d_model + d_head))
    wq = jax.random.normal(kwq, (h, d_head, d_model), jnp.float32) * std_head
    wk = jax.random.normal(kwk, (h, d_head, d_model), jnp.float32) * std_head
    wv = jax.random.normal(kwv, (h, d_head, d_model), jnp.float32) * std_head
    std_out = math.sqrt(2.0 / (d_model + d_model))
    wo = jax.random.normal(kwo, (d_model, d_model), jnp.float32) * std_out
    bo = jax.random.uniform(kbo, (d_model,), jnp.float32,
                            minval=-1.0 / math.sqrt(d_model),
                            maxval=1.0 / math.sqrt(d_model))

    ref = reference(v, k, q, m, wq, wk, wv, wo, bo, h=h)

    # f32 compute path: bit-close to the PyTorch module (approx-recip only).
    out_f32 = masked_multi_head_attention(v, k, q, m, wq, wk, wv, wo, bo, h=h,
                                          compute_dtype=jnp.float32)
    out_f32 = jax.block_until_ready(out_f32)
    assert out_f32.shape == (B, S, d_model)
    assert jnp.allclose(out_f32, ref, atol=2e-2, rtol=2e-2), \
        "f32 kernel mismatch vs pure-JAX reference"

    # Default (bf16 MXU operands, f32 accumulation) path.
    out_bf16 = masked_multi_head_attention(v, k, q, m, wq, wk, wv, wo, bo, h=h)
    out_bf16 = jax.block_until_ready(out_bf16)
    assert out_bf16.shape == (B, S, d_model)
    assert jnp.allclose(out_bf16, ref, atol=2e-1, rtol=1e-1), \
        "bf16 kernel mismatch vs pure-JAX reference"

    print("KERNEL_OK")
</pallas_src>

<mosaic_0001>
module attributes {stable_mosaic.version = 11 : i64} {
  func.func @qkv_proj_kernel(%arg0: i32, %arg1: memref<16x32xf32, #tpu.memory_space<vmem>>, %arg2: memref<16x32xf32, #tpu.memory_space<vmem>>, %arg3: memref<16x32xf32, #tpu.memory_space<vmem>>, %arg4: memref<16x1xf32, #tpu.memory_space<vmem>>, %arg5: memref<32x32xf32, #tpu.memory_space<vmem>>, %arg6: memref<32x32xf32, #tpu.memory_space<vmem>>, %arg7: memref<32x32xf32, #tpu.memory_space<vmem>>, %arg8: memref<16x32xf32, #tpu.memory_space<vmem>>, %arg9: memref<16x32xf32, #tpu.memory_space<vmem>>, %arg10: memref<16x32xf32, #tpu.memory_space<vmem>>) attributes {dimension_semantics = [#tpu.dimension_semantics<parallel>], iteration_bounds = array<i64: 1>, scalar_prefetch = 0 : i64, scratch_operands = 0 : i64, tpu.core_type = #tpu.core_type<tc>, window_params = [{transform_indices = @transform_0, window_bounds = array<i64: 16, 32>}, {transform_indices = @transform_1, window_bounds = array<i64: 16, 32>}, {transform_indices = @transform_2, window_bounds = array<i64: 16, 32>}, {transform_indices = @transform_3, window_bounds = array<i64: 16, 1>}, {pipeline_mode = #tpu.pipeline_mode<synchronous>, transform_indices = @transform_4, window_bounds = array<i64: 32, 32>}, {pipeline_mode = #tpu.pipeline_mode<synchronous>, transform_indices = @transform_5, window_bounds = array<i64: 32, 32>}, {pipeline_mode = #tpu.pipeline_mode<synchronous>, transform_indices = @transform_6, window_bounds = array<i64: 32, 32>}, {transform_indices = @transform_7, window_bounds = array<i64: 16, 32>}, {transform_indices = @transform_8, window_bounds = array<i64: 16, 32>}, {transform_indices = @transform_9, window_bounds = array<i64: 16, 32>}]} {
    %c0 = arith.constant 0 : index
    %c0_0 = arith.constant 0 : index
    %0 = vector.load %arg1[%c0, %c0_0] : memref<16x32xf32, #tpu.memory_space<vmem>>, vector<16x32xf32>
    %c0_1 = arith.constant 0 : index
    %c0_2 = arith.constant 0 : index
    %1 = vector.load %arg5[%c0_1, %c0_2] : memref<32x32xf32, #tpu.memory_space<vmem>>, vector<32x32xf32>
    %cst = arith.constant dense<0.000000e+00> : vector<16x32xf32>
    %2 = tpu.matmul %0, %1, %cst {dimension_numbers = #tpu.dot_dimension_numbers<[1], [0], [0], [1], [0, 0, 1, 1], [], []>} : vector<16x32xf32>, vector<32x32xf32>, vector<16x32xf32> -> vector<16x32xf32>
    %c0_3 = arith.constant 0 : index
    %c0_4 = arith.constant 0 : index
    %3 = vector.load %arg4[%c0_3, %c0_4] : memref<16x1xf32, #tpu.memory_space<vmem>>, vector<16x1xf32>
    %cst_5 = arith.constant 0.353553385 : f32
    %4 = vector.broadcast %cst_5 : f32 to vector<16x1xf32>
    %5 = arith.mulf %3, %4 : vector<16x1xf32>
    %6 = vector.broadcast %5 : vector<16x1xf32> to vector<16x32xf32>
    %7 = arith.mulf %2, %6 : vector<16x32xf32>
    %c0_6 = arith.constant 0 : index
    %c0_7 = arith.constant 0 : index
    %8 = vector.load %arg8[%c0_6, %c0_7] : memref<16x32xf32, #tpu.memory_space<vmem>>, vector<16x32xf32>
    tpu.vector_store %arg8[%c0_6, %c0_7], %7 {strides = array<i32>} : memref<16x32xf32, #tpu.memory_space<vmem>>, vector<16x32xf32>,
    %c0_8 = arith.constant 0 : index
    %c0_9 = arith.constant 0 : index
    %9 = vector.load %arg2[%c0_8, %c0_9] : memref<16x32xf32, #tpu.memory_space<vmem>>, vector<16x32xf32>
    %c0_10 = arith.constant 0 : index
    %c0_11 = arith.constant 0 : index
    %10 = vector.load %arg6[%c0_10, %c0_11] : memref<32x32xf32, #tpu.memory_space<vmem>>, vector<32x32xf32>
    %cst_12 = arith.constant dense<0.000000e+00> : vector<16x32xf32>
    %11 = tpu.matmul %9, %10, %cst_12 {dimension_numbers = #tpu.dot_dimension_numbers<[1], [0], [0], [1], [0, 0, 1, 1], [], []>} : vector<16x32xf32>, vector<32x32xf32>, vector<16x32xf32> -> vector<16x32xf32>
    %c0_13 = arith.constant 0 : index
    %c0_14 = arith.constant 0 : index
    %12 = vector.load %arg9[%c0_13, %c0_14] : memref<16x32xf32, #tpu.memory_space<vmem>>, vector<16x32xf32>
    tpu.vector_store %arg9[%c0_13, %c0_14], %11 {strides = array<i32>} : memref<16x32xf32, #tpu.memory_space<vmem>>, vector<16x32xf32>,
    %c0_15 = arith.constant 0 : index
    %c0_16 = arith.constant 0 : index
    %13 = vector.load %arg3[%c0_15, %c0_16] : memref<16x32xf32, #tpu.memory_space<vmem>>, vector<16x32xf32>
    %c0_17 = arith.constant 0 : index
    %c0_18 = arith.constant 0 : index
    %14 = vector.load %arg7[%c0_17, %c0_18] : memref<32x32xf32, #tpu.memory_space<vmem>>, vector<32x32xf32>
    %cst_19 = arith.constant dense<0.000000e+00> : vector<16x32xf32>
    %15 = tpu.matmul %13, %14, %cst_19 {dimension_numbers = #tpu.dot_dimension_numbers<[1], [0], [0], [1], [0, 0, 1, 1], [], []>} : vector<16x32xf32>, vector<32x32xf32>, vector<16x32xf32> -> vector<16x32xf32>
    %c0_20 = arith.constant 0 : index
    %c0_21 = arith.constant 0 : index
    %16 = vector.load %arg10[%c0_20, %c0_21] : memref<16x32xf32, #tpu.memory_space<vmem>>, vector<16x32xf32>
    tpu.vector_store %arg10[%c0_20, %c0_21], %15 {strides = array<i32>} : memref<16x32xf32, #tpu.memory_space<vmem>>, vector<16x32xf32>,
    return
  }
  func.func @transform_0(%arg0: i32) -> (i32, i32) {
    %c0_i32 = arith.constant 0 : i32
    %c0_i32_0 = arith.constant 0 : i32
    return %arg0, %c0_i32 : i32, i32
  }
  func.func @transform_1(%arg0: i32) -> (i32, i32) {
    %c0_i32 = arith.constant 0 : i32
    %c0_i32_0 = arith.constant 0 : i32
    return %arg0, %c0_i32 : i32, i32
  }
  func.func @transform_2(%arg0: i32) -> (i32, i32) {
    %c0_i32 = arith.constant 0 : i32
    %c0_i32_0 = arith.constant 0 : i32
    return %arg0, %c0_i32 : i32, i32
  }
  func.func @transform_3(%arg0: i32) -> (i32, i32) {
    %c0_i32 = arith.constant 0 : i32
    %c0_i32_0 = arith.constant 0 : i32
    return %arg0, %c0_i32 : i32, i32
  }
  func.func @transform_4(%arg0: i32) -> (i32, i32) {
    %c0_i32 = arith.constant 0 : i32
    %c0_i32_0 = arith.constant 0 : i32
    %c0_i32_1 = arith.constant 0 : i32
    return %c0_i32, %c0_i32_0 : i32, i32
  }
  func.func @transform_5(%arg0: i32) -> (i32, i32) {
    %c0_i32 = arith.constant 0 : i32
    %c0_i32_0 = arith.constant 0 : i32
    %c0_i32_1 = arith.constant 0 : i32
    return %c0_i32, %c0_i32_0 : i32, i32
  }
  func.func @transform_6(%arg0: i32) -> (i32, i32) {
    %c0_i32 = arith.constant 0 : i32
    %c0_i32_0 = arith.constant 0 : i32
    %c0_i32_1 = arith.constant 0 : i32
    return %c0_i32, %c0_i32_0 : i32, i32
  }
  func.func @transform_7(%arg0: i32) -> (i32, i32) {
    %c0_i32 = arith.constant 0 : i32
    %c0_i32_0 = arith.constant 0 : i32
    return %arg0, %c0_i32 : i32, i32
  }
  func.func @transform_8(%arg0: i32) -> (i32, i32) {
    %c0_i32 = arith.constant 0 : i32
    %c0_i32_0 = arith.constant 0 : i32
    return %arg0, %c0_i32 : i32, i32
  }
  func.func @transform_9(%arg0: i32) -> (i32, i32) {
    %c0_i32 = arith.constant 0 : i32
    %c0_i32_0 = arith.constant 0 : i32
    return %arg0, %c0_i32 : i32, i32
  }
}

</mosaic_0001>

<bundles_post_ra>
// kernel: tpu_custom_call.1
= control target key start
LH: loop header
LB: loop body
LE: loop exit
PB: predicated region body
PF: predicated region fallthrough
CT: control target
= control target key end

     0   :  { %15 = vsyncpa [#allocation3], 0  ;;  %s805_s0 = inlined_call_operand.vmem [shape: f32[16,32], index: 0, kind: input, shape index: {}]   ;;  %s806_s1 = inlined_call_operand.hbm [shape: f32[16,32], index: 1, kind: input, shape index: {}]   ;;  %s807_s2 = inlined_call_operand.hbm [shape: f32[16,32], index: 2, kind: input, shape index: {}]   ;;  %s808_s3 = inlined_call_operand.vmem [shape: f32[16,1], index: 3, kind: input, shape index: {}]   ;;  %s809_s4 = inlined_call_operand.hbm [shape: f32[32,32], index: 4, kind: input, shape index: {}]   ;;  %s810_s5 = inlined_call_operand.hbm [shape: f32[32,32], index: 5, kind: input, shape index: {}]   ;;  %s811_s6 = inlined_call_operand.hbm [shape: f32[32,32], index: 6, kind: input, shape index: {}]   ;;  %s812_s7 = inlined_call_operand.hbm [shape: f32[16,32], index: 7, kind: output, shape index: {0}]   ;;  %s813_s8 = inlined_call_operand.hbm [shape: f32[16,32], index: 8, kind: output, shape index: {1}]   ;;  %s814_s9 = inlined_call_operand.hbm [shape: f32[16,32], index: 9, kind: output, shape index: {2}]  }
   0x1   :  { %16 = vsyncpa [#allocation6], 0 }
   0x2   :  { %17 = vsyncpa [#allocation9], 0 }
   0x3   :  { %18 = vsyncpa [#allocation4], 0 }
   0x4   :  { %19 = vsyncpa [#allocation13], 0  ;;  %s672_s30 = smov [#allocation5]   ;;  %s673_s11 = smov [#allocation8]  }
   0x5   :  { %s39_s10 = sshll.u32 %s672_s30, 4  ;;  %s65_s12 = sshll.u32 %s673_s11, 4  ;;  %s40_s10 = int_to_ptr.vmem [resolvable:$true] %s39_s10  ;;  %s66_s12 = int_to_ptr.vmem [resolvable:$true] %s65_s12 }
   0x6   :  { %s510_s13 = scalar_lea.vmem %s40_s10, 256  ;;  %p515_p1 = scmp.lt.s32.totalorder %s40_s10, %s40_s10 }
   0x7   :  { %p511_p0 = scmp.ne.s32.totalorder %s40_s10, %s510_s13  ;;  %p516_p2 = scmp.lt.s32.totalorder %s510_s13, %s510_s13 }
   0x9   :  { %p517_p3 = por %p516_p2, %p515_p1 }
   0xb   :  { %p518_p4 = pnand %p517_p3, %p511_p0 }
   0xd   :  { %521 = shalt.err (!%p518_p4)
}
   0xe   :  { %s674_s14 = smov 128   ;;  %s675_s15 = smov 8  }
   0xf   :  { %45 = dma.hbm_to_vmem [thread:$0]  %s807_s2, 256, %s40_s10, [#allocation6], %s674_s14, %s674_s14, %s675_s15  }
  0x10   :  { %s530_s18 = scalar_lea.vmem %s66_s12, 512  ;;  %p535_p6 = scmp.lt.s32.totalorder %s66_s12, %s66_s12 }
  0x11   :  { %p531_p5 = scmp.ne.s32.totalorder %s66_s12, %s530_s18  ;;  %p536_p7 = scmp.lt.s32.totalorder %s530_s18, %s530_s18 }
  0x13   :  { %p537_p8 = por %p536_p7, %p535_p6 }
  0x15   :  { %p538_p9 = pnand %p537_p8, %p531_p5 }
  0x17   :  { %541 = shalt.err (!%p538_p9)
}
  0x18   :  { %71 = dma.hbm_to_vmem [thread:$0]  %s810_s5, 512, %s66_s12, [#allocation9], %s674_s14, %s674_s14, %s675_s15  }
  0x19   :  { %s676_s21 = smov [#allocation2]   ;;  %s677_s23 = smov [#allocation7]  }
  0x1a   :  { %s27_s22 = sshll.u32 %s676_s21, 4  ;;  %s53_s24 = sshll.u32 %s677_s23, 4  ;;  %s28_s22 = int_to_ptr.vmem [resolvable:$true] %s27_s22  ;;  %s54_s24 = int_to_ptr.vmem [resolvable:$true] %s53_s24 }
  0x1b   :  { %s550_s2 = scalar_lea.vmem %s28_s22, 256  ;;  %p555_p11 = scmp.lt.s32.totalorder %s28_s22, %s28_s22 }
  0x1c   :  { %p551_p10 = scmp.ne.s32.totalorder %s28_s22, %s550_s2  ;;  %p556_p12 = scmp.lt.s32.totalorder %s550_s2, %s550_s2 }
  0x1e   :  { %p557_p13 = por %p556_p12, %p555_p11 }
  0x20   :  { %p558_p0 = pnand %p557_p13, %p551_p10 }
  0x22   :  { %561 = shalt.err (!%p558_p0)
}
  0x23   :  { %33 = dma.hbm_to_vmem [thread:$0]  %s806_s1, 256, %s28_s22, [#allocation3], %s674_s14, %s674_s14, %s675_s15  }
  0x24   :  { %s570_s5 = scalar_lea.vmem %s54_s24, 512  ;;  %p575_p2 = scmp.lt.s32.totalorder %s54_s24, %s54_s24 }
  0x25   :  { %p571_p1 = scmp.ne.s32.totalorder %s54_s24, %s570_s5  ;;  %p576_p3 = scmp.lt.s32.totalorder %s570_s5, %s570_s5 }
  0x27   :  { %p577_p4 = por %p576_p3, %p575_p2 }
  0x29   :  { %p578_p5 = pnand %p577_p4, %p571_p1 }
  0x2b   :  { %581 = shalt.err (!%p578_p5)
}
  0x2c   :  { %59 = dma.hbm_to_vmem [thread:$0]  %s809_s4, 512, %s54_s24, [#allocation6], %s674_s14, %s674_s14, %s675_s15  }
  0x2d   :  { %s678_s29 = smov [#allocation10]  }
  0x2e   :  { %s77_s30 = sshll.u32 %s678_s29, 4  ;;  %s78_s30 = int_to_ptr.vmem [resolvable:$true] %s77_s30 }
  0x2f   :  { %s590_s10 = scalar_lea.vmem %s78_s30, 512  ;;  %p595_p7 = scmp.lt.s32.totalorder %s78_s30, %s78_s30 }
  0x30   :  { %p591_p6 = scmp.ne.s32.totalorder %s78_s30, %s590_s10  ;;  %p596_p8 = scmp.lt.s32.totalorder %s590_s10, %s590_s10 }
  0x32   :  { %p597_p9 = por %p596_p8, %p595_p7 }
  0x34   :  { %p598_p10 = pnand %p597_p9, %p591_p6 }
  0x36   :  { %601 = shalt.err (!%p598_p10)
}
  0x37   :  { %83 = dma.hbm_to_vmem [thread:$0]  %s811_s6, 512, %s78_s30, [#allocation9], %s674_s14, %s674_s14, %s675_s15  }
  0x38   :  { %662 = dma.done.wait [#allocation3], 256  }
  0x39   :  { %663 = vsyncadd [#allocation3], 4294967040 }
  0x3a   :  { %664 = dma.done.wait [#allocation6], 768  }
  0x3b   :  { %665 = vsyncadd [#allocation6], 4294966528 }
  0x3c   :  { %666 = dma.done.wait [#allocation9], 1024  }
  0x3d   :  { %667 = vsyncadd [#allocation9], 4294966272  ;;  %v679_v0 = vmov 0   ;;  %v104_v1 = vld [vmem:[#allocation7 + $0x18] sm:$0xff]  ;;  %v103_v2 = vld [vmem:[#allocation7 + $0x10] sm:$0xff]  ;;  %vm105_vm0 = vcmask 261120  }
  0x3e   :  { %501 = vset.pattern.permute.xlu0 %v679_v0  ;;  %457 = vmatprep.subr.mxu0 %v104_v1  ;;  %v210_v3 = vld [vmem:[#allocation8 + $0x18] sm:$0xff]  ;;  %v99_v4 = vld [vmem:[%s805_s0] sm:$0xff]  ;;  %v102_v5 = vld [vmem:[#allocation7 + $0x8] sm:$0xff]  ;;  %s680_s19 = smov [#allocation11]   ;;  %s682_s22 = smov [#allocation14]  }
  0x3f   :  { %458 = vmatpush3.msra.mxu0 %v104_v1  ;;  %468 = vmatprep.subr.mxu1 %v210_v3  ;;  %v209_v6 = vld [vmem:[#allocation8 + $0x10] sm:$0xff]  ;;  %v101_v7 = vld [vmem:[#allocation7] sm:$0xff]  ;;  %v208_v8 = vld [vmem:[#allocation8 + $0x8] sm:$0xff]  ;;  %s388_s20 = sshll.u32 %s680_s19, 4  ;;  %s412_s23 = sshll.u32 %s682_s22, 4  ;;  %s389_s20 = int_to_ptr.vmem [resolvable:$true] %s388_s20  ;;  %s413_s23 = int_to_ptr.vmem [resolvable:$true] %s412_s23 }
  0x40   :  { %459 = vmatprep.subr.mxu0 %v103_v2  ;;  %469 = vmatpush3.msra.mxu1 %v210_v3  ;;  %v100_v9 = vld [vmem:[%s805_s0 + $0x8] sm:$0xff]  ;;  %v299_v10 = vld [vmem:[#allocation10 + $0x18] sm:$0xff]  ;;  %v207_v11 = vld [vmem:[#allocation8] sm:$0xff]  ;;  %s602_s24 = scalar_lea.vmem %s389_s20, 256  ;;  %p607_p12 = scmp.lt.s32.totalorder %s389_s20, %s389_s20 }
  0x41   :  { %460 = vmatpush3.msra.mxu0 %v103_v2  ;;  %465 = vmatprep.mubr.msk.f32.mxu0 %vm105_vm0, %v99_v4  ;;  %v298_v12 = vld [vmem:[#allocation10 + $0x10] sm:$0xff]  ;;  %v187_v13 = vld [vmem:[%s808_s3] sm:$0xff]  ;;  %v297_v15 = vld [vmem:[#allocation10 + $0x8] sm:$0xff]  ;;  %p603_p11 = scmp.ne.s32.totalorder %s389_s20, %s602_s24  ;;  %p608_p13 = scmp.lt.s32.totalorder %s602_s24, %s602_s24 }
  0x42   :  { %461 = vmatprep.subr.mxu0 %v102_v5  ;;  %470 = vmatprep.subr.mxu1 %v209_v6  ;;  %v205_v14 = vld [vmem:[#allocation2] sm:$0xff]  ;;  %v206_v16 = vld [vmem:[#allocation2 + $0x8] sm:$0xff]  ;;  %v294_v17 = vld [vmem:[#allocation5] sm:$0xff]  ;;  %v189_v18 = vmul.f32 0.35355338, %v187_v13 }
  0x43   :  { %462 = vmatpush3.msra.mxu0 %v102_v5  ;;  %471 = vmatpush3.msra.mxu1 %v209_v6  ;;  %v296_v19 = vld [vmem:[#allocation10] sm:$0xff]  ;;  %v188_v20 = vld [vmem:[%s808_s3 + $0x8] sm:$0xff]  ;;  %v295_v21 = vld [vmem:[#allocation5 + $0x8] sm:$0xff]  ;;  %s681_s3 = smov [#allocation12]   ;;  %p609_p0 = por %p608_p13, %p607_p12 }
  0x44   :  { %463 = vmatprep.subr.mxu0 %v101_v7  ;;  %472 = vmatprep.subr.mxu1 %v208_v8  ;;  %v190_v22 = vmul.f32 0.35355338, %v188_v20  ;;  %s400_s21 = sshll.u32 %s681_s3, 4  ;;  %s401_s21 = int_to_ptr.vmem [resolvable:$true] %s400_s21 }
  0x45   :  { %464 = vmatpush3.msra.mxu0 %v101_v7  ;;  %473 = vmatpush3.msra.mxu1 %v208_v8  ;;  %p610_p1 = pnand %p609_p0, %p603_p11 }
  0x46   :  { %466 = vmatmul.mubr.msk.f32.vlgmr.msra.gmra.mxu0 %vm105_vm0, %v100_v9  ;;  %479 = vmatprep.subr.mxu0 %v299_v10 }
  0x47   :  { %480 = vmatpush3.msra.mxu0 %v299_v10  ;;  %474 = vmatprep.subr.mxu1 %v207_v11 }
  0x48   :  { %481 = vmatprep.subr.mxu0 %v298_v12  ;;  %475 = vmatpush3.msra.mxu1 %v207_v11 }
  0x49   :  { %482 = vmatpush3.msra.mxu0 %v298_v12  ;;  %476 = vmatprep.mubr.msk.f32.mxu1 %vm105_vm0, %v205_v14 }
  0x4a   :  { %483 = vmatprep.subr.mxu0 %v297_v15  ;;  %477 = vmatmul.mubr.msk.f32.vlgmr.msra.gmra.mxu1 %vm105_vm0, %v206_v16 }
  0x4b   :  { %484 = vmatpush3.msra.mxu0 %v297_v15  ;;  %487 = vmatprep.mubr.msk.f32.mxu0 %vm105_vm0, %v294_v17 }
  0x4c   :  { %485 = vmatprep.subr.mxu0 %v296_v19  ;;  %193 = vperm.xlu0 %501, %v189_v18  }
  0x4d   :  { %486 = vmatpush3.msra.mxu0 %v296_v19 }
  0x4e   :  { %488 = vmatmul.mubr.msk.f32.vlgmr.msra.gmra.mxu0 %vm105_vm0, %v295_v21 }
  0x50   :  { %198 = vperm.xlu0 %501, %v190_v22  }
  0xc7   :  { %v194_v23 = vpop.permute.xlu0 %193 }
  0xcb   :  { %v199_v24 = vpop.permute.xlu0 %198 }
 0x106   :  { %v467_v25 = vpop.f32.mrf.mxu0 }
 0x107   :  { %v202_v26 = vmul.f32 %v467_v25, %v199_v24 }
 0x108   :  { %v178_v27 = vpop.f32.mrf.mxu0 }
 0x109   :  { %204 = vst.msk [vmem:[#allocation11 + $0x8] sm:$0xff] %vm105_vm0, %v202_v26  ;;  %v201_v28 = vmul.f32 %v194_v23, %v178_v27 }
 0x10a   :  { %v478_v29 = vpop.f32.mrf.mxu1 }
 0x10b   :  { %203 = vst.msk [vmem:[#allocation11] sm:$0xff] %vm105_vm0, %v201_v28  ;;  %293 = vst.msk [vmem:[#allocation12 + $0x8] sm:$0xff] %vm105_vm0, %v478_v29 }
 0x10c   :  { %v283_v30 = vpop.f32.mrf.mxu1 }
 0x10d   :  { %613 = shalt.err (!%p610_p1)
}
 0x10e   :  { %394 = dma.vmem_to_hbm [thread:$0]  %s389_s20, 256, %s812_s7, [#allocation4], %s674_s14, %s674_s14, %s675_s15   ;;  %292 = vst.msk [vmem:[#allocation12] sm:$0xff] %vm105_vm0, %v283_v30  ;;  %v489_v31 = vpop.f32.mrf.mxu0 }
 0x10f   :  { %s622_s26 = scalar_lea.vmem %s401_s21, 256  ;;  %p627_p3 = scmp.lt.s32.totalorder %s401_s21, %s401_s21 }
 0x110   :  { %p623_p2 = scmp.ne.s32.totalorder %s401_s21, %s622_s26  ;;  %p628_p4 = scmp.lt.s32.totalorder %s622_s26, %s622_s26 }
 0x112   :  { %p629_p5 = por %p628_p4, %p627_p3 }
 0x114   :  { %p630_p6 = pnand %p629_p5, %p623_p2 }
 0x116   :  { %633 = shalt.err (!%p630_p6)
}
 0x117   :  { %406 = dma.vmem_to_hbm [thread:$0]  %s401_s21, 256, %s813_s8, [#allocation13], %s674_s14, %s674_s14, %s675_s15   ;;  %382 = vst.msk [vmem:[#allocation14 + $0x8] sm:$0xff] %vm105_vm0, %v489_v31  ;;  %v372_v32 = vpop.f32.mrf.mxu0 }
 0x118   :  { %381 = vst.msk [vmem:[#allocation14] sm:$0xff] %vm105_vm0, %v372_v32  ;;  %s642_s7 = scalar_lea.vmem %s413_s23, 256  ;;  %p647_p8 = scmp.lt.s32.totalorder %s413_s23, %s413_s23 }
 0x119   :  { %p643_p7 = scmp.ne.s32.totalorder %s413_s23, %s642_s7  ;;  %p648_p9 = scmp.lt.s32.totalorder %s642_s7, %s642_s7 }
 0x11b   :  { %p649_p10 = por %p648_p9, %p647_p8 }
 0x11d   :  { %p650_p11 = pnand %p649_p10, %p643_p7 }
 0x11f   :  { %653 = shalt.err (!%p650_p11)
}
 0x120   :  { %418 = dma.vmem_to_hbm [thread:$0]  %s413_s23, 256, %s814_s9, [#allocation13], %s674_s14, %s674_s14, %s675_s15  }
 0x121   :  { %668 = dma.done.wait [#allocation4], 256  }
 0x122   :  { %669 = vsyncadd [#allocation4], 4294967040 }
 0x123   :  { %670 = dma.done.wait [#allocation13], 512  }
 0x124   :  { %671 = vsyncadd [#allocation13], 4294966784 }
 0x125   :  { %428 = vsyncpa [#allocation3], 1 }
 0x126   :  { %429 = vsyncpa [#allocation6], 1 }
 0x127   :  { %430 = vsyncpa [#allocation9], 1 }
 0x128   :  { %431 = vsyncpa [#allocation4], 1 }
 0x129   :  { %432 = vsyncpa [#allocation13], 1 }

</bundles_post_ra>
